<compile_context>
chip_gen: v7x
topology: tpu7x:2x2x1
jax: 0.10.0
libtpu: 0.0.40
codegen_flags: <defaults>
</compile_context>

<pallas_src>
import functools
from typing import NamedTuple

import jax
import jax.numpy as jnp
from jax.experimental import pallas as pl
from jax.experimental.pallas import tpu as pltpu

LANE = 128


def _round_up(n, m):
    return ((n + m - 1) // m) * m


def _sublane(dtype):
    # Sublane packing of the second-to-last dim: 8 rows for 32-bit, 16 for bf16.
    return 16 if jnp.dtype(dtype) == jnp.dtype(jnp.bfloat16) else 8


def _default_matmul_dtype():
    # bf16 MXU operands on v6e / v7x; keep f32 on older generations (no bf16 VPU on v5e).
    try:
        kind = jax.devices()[0].device_kind.lower()
    except Exception:
        return jnp.float32
    if "v6" in kind or "v7" in kind:
        return jnp.bfloat16
    return jnp.float32


class ANetParams(NamedTuple):
    # Original (unpadded, f32) parameters -- used by the small-batch fused-XLA fallback.
    w1: jax.Array
    b1: jax.Array
    w2: jax.Array
    b2: jax.Array
    # Pre-padded / pre-cast parameters for the Pallas path (hoisted out of the call path).
    w1p: jax.Array
    b1p: jax.Array
    w2p: jax.Array
    b2p: jax.Array


def prepare_params(w1, b1, w2, b2, matmul_dtype=None):
    """Pad/cast the weights once; pass the result to anetwork_forward repeatedly."""
    if matmul_dtype is None:
        matmul_dtype = _default_matmul_dtype()
    S, H = w1.shape
    A = w2.shape[1]
    sub = _sublane(matmul_dtype)
    S_p = _round_up(S, sub)        # 4 -> 8 (f32) / 16 (bf16)
    H_p = _round_up(H, LANE)       # 64 -> 128
    A_p = _round_up(A, 8)          # 2 -> 8 (full-dim last-axis block is legal; keeps vst small)
    w1p = jnp.pad(w1, ((0, S_p - S), (0, H_p - H))).astype(matmul_dtype)
    w2p = jnp.pad(w2, ((0, H_p - H), (0, A_p - A))).astype(matmul_dtype)
    b1p = jnp.pad(b1.reshape(1, H), ((0, 0), (0, H_p - H))).astype(jnp.float32)
    b2p = jnp.pad(b2.reshape(1, A), ((0, 0), (0, A_p - A))).astype(jnp.float32)
    return ANetParams(w1, b1, w2, b2, w1p, b1p, w2p, b2p)


def anet_kernel(x_ref, w1_ref, b1_ref, w2_ref, b2_ref, o_ref):
    # Layer 1: MXU matmul (f32 accumulation), VPU bias-add + ReLU (free filler under MXU).
    h = jnp.dot(x_ref[...], w1_ref[...], preferred_element_type=jnp.float32)
    h = jnp.maximum(h + b1_ref[...], 0.0)
    # Layer 2: cast back to the matmul dtype (bf16 on the bf16 path), accumulate in f32.
    y = jnp.dot(h.astype(w2_ref.dtype), w2_ref[...], preferred_element_type=jnp.float32)
    o_ref[...] = (y + b2_ref[...]).astype(o_ref.dtype)


@functools.partial(jax.jit, static_argnames=("block_b", "min_pallas_batch"))
def anetwork_forward(x, params: ANetParams, *, block_b=2048, min_pallas_batch=128):
    """ANetwork forward. x: [B, S] f32; params from prepare_params()."""
    B, S = x.shape
    A = params.w2.shape[1]

    # Small-batch fallback: at RL act() sizes a fused XLA dot beats any custom call.
    if B < min_pallas_batch:
        h = jnp.maximum(x @ params.w1 + params.b1[None, :], 0.0)
        return h @ params.w2 + params.b2[None, :]

    w1p, b1p, w2p, b2p = params.w1p, params.b1p, params.w2p, params.b2p
    matmul_dtype = w1p.dtype
    S_p, H_p = w1p.shape
    A_p = w2p.shape[1]
    sub = _sublane(matmul_dtype)

    # Batch tiling: large tiles to amortize per-grid-step overhead, but >=2 tiles when B
    # allows so the "parallel" batch axis feeds both v7x TensorCores. Always sublane-aligned.
    block_b = _round_up(max(block_b, sub), sub)
    n_tiles = max(2, pl.cdiv(B, block_b))
    TB = _round_up(pl.cdiv(B, n_tiles), sub)
    B_p = _round_up(B, TB)
    grid = (B_p // TB,)

    # Only the activation is padded per call (zeros contribute nothing to the matmuls).
    xp = jnp.pad(x, ((0, B_p - B), (0, S_p - S))).astype(matmul_dtype)

    itemsize = jnp.dtype(matmul_dtype).itemsize
    cost = pl.CostEstimate(
        flops=2 * B_p * (S_p * H_p + H_p * A_p),
        transcendentals=0,
        bytes_accessed=(B_p * S_p * itemsize          # x
                        + S_p * H_p * itemsize        # w1
                        + H_p * A_p * itemsize        # w2
                        + (H_p + A_p) * 4             # biases (f32)
                        + B_p * A_p * 4),             # out (f32, 8 lanes)
    )

    out_p = pl.pallas_call(
        anet_kernel,
        out_shape=jax.ShapeDtypeStruct((B_p, A_p), jnp.float32),
        grid_spec=pltpu.PrefetchScalarGridSpec(
            num_scalar_prefetch=0,
            grid=grid,
            in_specs=[
                pl.BlockSpec((TB, S_p), lambda i: (i, 0)),    # x: streamed per batch tile
                pl.BlockSpec((S_p, H_p), lambda i: (0, 0)),   # w1: VMEM-resident
                pl.BlockSpec((1, H_p), lambda i: (0, 0)),     # b1: VMEM-resident
                pl.BlockSpec((H_p, A_p), lambda i: (0, 0)),   # w2: VMEM-resident
                pl.BlockSpec((1, A_p), lambda i: (0, 0)),     # b2: VMEM-resident
            ],
            out_specs=pl.BlockSpec((TB, A_p), lambda i: (i, 0)),
        ),
        compiler_params=pltpu.CompilerParams(
            dimension_semantics=("parallel",),  # batch-tile axis shards across v7x's 2 TCs
        ),
        cost_estimate=cost,
    )(xp, w1p, b1p, w2p, b2p)

    return out_p[:B, :A]


def init_params(key, state_dim, action_dim, hidden=64):
    # Deterministic init mimicking torch's uniform(-1/sqrt(fan_in), 1/sqrt(fan_in)).
    k1, k2, k3, k4 = jax.random.split(key, 4)
    lim1 = 1.0 / jnp.sqrt(jnp.float32(state_dim))
    lim2 = 1.0 / jnp.sqrt(jnp.float32(hidden))
    w1 = jax.random.uniform(k1, (state_dim, hidden), jnp.float32, -lim1, lim1)
    b1 = jax.random.uniform(k2, (hidden,), jnp.float32, -lim1, lim1)
    w2 = jax.random.uniform(k3, (hidden, action_dim), jnp.float32, -lim2, lim2)
    b2 = jax.random.uniform(k4, (action_dim,), jnp.float32, -lim2, lim2)
    return w1, b1, w2, b2


if __name__ == "__main__":
    # CartPole-v0: state_dim = 4, action_dim = 2.
    # TODO(synk): torch's x.cuda() device move has no kernel equivalent; JAX handles placement.
    state_dim, action_dim, batch = 4, 2, 8
    key = jax.random.PRNGKey(0)
    kx, kp = jax.random.split(key)
    x = jax.random.normal(kx, (batch, state_dim), jnp.float32)
    w1, b1, w2, b2 = init_params(kp, state_dim, action_dim)

    # Plain-JAX reference (same math as the torch nn.Sequential).
    ref = jnp.maximum(x @ w1 + b1[None, :], 0.0) @ w2 + b2[None, :]

    # Weight padding/casts hoisted: done once here, reused across calls.
    params_f32 = prepare_params(w1, b1, w2, b2, matmul_dtype=jnp.float32)
    params_bf16 = prepare_params(w1, b1, w2, b2, matmul_dtype=jnp.bfloat16)

    # f32-operand Pallas path (forced, even at tiny batch, to exercise the kernel).
    # Tolerance covers MXU pass differences vs. the XLA reference matmul.
    out = jax.block_until_ready(anetwork_forward(x, params_f32, min_pallas_batch=0))
    assert out.shape == (batch, action_dim)
    assert jnp.allclose(out, ref, atol=5e-3, rtol=5e-3)

    # bf16-operand Pallas path (MXU-native on v6e/v7x; f32 accumulation): loose tolerance.
    out_bf16 = jax.block_until_ready(anetwork_forward(x, params_bf16, min_pallas_batch=0))
    assert out_bf16.shape == (batch, action_dim)
    assert jnp.allclose(out_bf16, ref, atol=5e-2, rtol=5e-2)

    # Default small-batch fallback (fused XLA path, no custom call) at act()-time sizes.
    out_fb = jax.block_until_ready(anetwork_forward(x, params_f32))
    assert jnp.allclose(out_fb, ref, atol=1e-5, rtol=1e-5)

    # Larger batch exercising the Pallas path with >=2 grid tiles and batch padding.
    big_b = 1000
    xb = jax.random.normal(kx, (big_b, state_dim), jnp.float32)
    refb = jnp.maximum(xb @ w1 + b1[None, :], 0.0) @ w2 + b2[None, :]
    outb = jax.block_until_ready(anetwork_forward(xb, params_f32))
    assert outb.shape == (big_b, action_dim)
    assert jnp.allclose(outb, refb, atol=5e-3, rtol=5e-3)

    print("KERNEL_OK")
</pallas_src>

<mosaic_0001>
module attributes {stable_mosaic.version = 11 : i64} {
  func.func @anet_kernel(%arg0: i32, %arg1: memref<8x8xf32, #tpu.memory_space<vmem>>, %arg2: memref<8x128xf32, #tpu.memory_space<vmem>>, %arg3: memref<1x128xf32, #tpu.memory_space<vmem>>, %arg4: memref<128x8xf32, #tpu.memory_space<vmem>>, %arg5: memref<1x8xf32, #tpu.memory_space<vmem>>, %arg6: memref<8x8xf32, #tpu.memory_space<vmem>>) attributes {dimension_semantics = [#tpu.dimension_semantics<parallel>], iteration_bounds = array<i64: 1>, scalar_prefetch = 0 : i64, scratch_operands = 0 : i64, tpu.core_type = #tpu.core_type<tc>, window_params = [{transform_indices = @transform_0, window_bounds = array<i64: 8, 8>}, {pipeline_mode = #tpu.pipeline_mode<synchronous>, transform_indices = @transform_1, window_bounds = array<i64: 8, 128>}, {pipeline_mode = #tpu.pipeline_mode<synchronous>, transform_indices = @transform_2, window_bounds = array<i64: 1, 128>}, {pipeline_mode = #tpu.pipeline_mode<synchronous>, transform_indices = @transform_3, window_bounds = array<i64: 128, 8>}, {pipeline_mode = #tpu.pipeline_mode<synchronous>, transform_indices = @transform_4, window_bounds = array<i64: 1, 8>}, {transform_indices = @transform_5, window_bounds = array<i64: 8, 8>}]} {
    %c0 = arith.constant 0 : index
    %c0_0 = arith.constant 0 : index
    %0 = vector.load %arg1[%c0, %c0_0] : memref<8x8xf32, #tpu.memory_space<vmem>>, vector<8x8xf32>
    %c0_1 = arith.constant 0 : index
    %c0_2 = arith.constant 0 : index
    %1 = vector.load %arg2[%c0_1, %c0_2] : memref<8x128xf32, #tpu.memory_space<vmem>>, vector<8x128xf32>
    %cst = arith.constant dense<0.000000e+00> : vector<8x128xf32>
    %2 = tpu.matmul %0, %1, %cst {dimension_numbers = #tpu.dot_dimension_numbers<[1], [0], [0], [1], [0, 0, 1, 1], [], []>} : vector<8x8xf32>, vector<8x128xf32>, vector<8x128xf32> -> vector<8x128xf32>
    %c0_3 = arith.constant 0 : index
    %c0_4 = arith.constant 0 : index
    %3 = vector.load %arg3[%c0_3, %c0_4] : memref<1x128xf32, #tpu.memory_space<vmem>>, vector<1x128xf32>
    %4 = vector.broadcast %3 : vector<1x128xf32> to vector<8x128xf32>
    %5 = arith.addf %2, %4 : vector<8x128xf32>
    %cst_5 = arith.constant 0.000000e+00 : f32
    %6 = vector.broadcast %cst_5 : f32 to vector<8x128xf32>
    %7 = arith.maximumf %5, %6 : vector<8x128xf32>
    %c0_6 = arith.constant 0 : index
    %c0_7 = arith.constant 0 : index
    %8 = vector.load %arg4[%c0_6, %c0_7] : memref<128x8xf32, #tpu.memory_space<vmem>>, vector<128x8xf32>
    %cst_8 = arith.constant dense<0.000000e+00> : vector<8x8xf32>
    %9 = tpu.matmul %7, %8, %cst_8 {dimension_numbers = #tpu.dot_dimension_numbers<[1], [0], [0], [1], [0, 0, 1, 1], [], []>} : vector<8x128xf32>, vector<128x8xf32>, vector<8x8xf32> -> vector<8x8xf32>
    %c0_9 = arith.constant 0 : index
    %c0_10 = arith.constant 0 : index
    %10 = vector.load %arg5[%c0_9, %c0_10] : memref<1x8xf32, #tpu.memory_space<vmem>>, vector<1x8xf32>
    %11 = vector.broadcast %10 : vector<1x8xf32> to vector<8x8xf32>
    %12 = arith.addf %9, %11 : vector<8x8xf32>
    %c0_11 = arith.constant 0 : index
    %c0_12 = arith.constant 0 : index
    %13 = vector.load %arg6[%c0_11, %c0_12] : memref<8x8xf32, #tpu.memory_space<vmem>>, vector<8x8xf32>
    tpu.vector_store %arg6[%c0_11, %c0_12], %12 {strides = array<i32>} : memref<8x8xf32, #tpu.memory_space<vmem>>, vector<8x8xf32>,
    return
  }
  func.func @transform_0(%arg0: i32) -> (i32, i32) {
    %c0_i32 = arith.constant 0 : i32
    %c0_i32_0 = arith.constant 0 : i32
    return %arg0, %c0_i32 : i32, i32
  }
  func.func @transform_1(%arg0: i32) -> (i32, i32) {
    %c0_i32 = arith.constant 0 : i32
    %c0_i32_0 = arith.constant 0 : i32
    %c0_i32_1 = arith.constant 0 : i32
    return %c0_i32, %c0_i32_0 : i32, i32
  }
  func.func @transform_2(%arg0: i32) -> (i32, i32) {
    %c0_i32 = arith.constant 0 : i32
    %c0_i32_0 = arith.constant 0 : i32
    %c0_i32_1 = arith.constant 0 : i32
    return %c0_i32, %c0_i32_0 : i32, i32
  }
  func.func @transform_3(%arg0: i32) -> (i32, i32) {
    %c0_i32 = arith.constant 0 : i32
    %c0_i32_0 = arith.constant 0 : i32
    %c0_i32_1 = arith.constant 0 : i32
    return %c0_i32, %c0_i32_0 : i32, i32
  }
  func.func @transform_4(%arg0: i32) -> (i32, i32) {
    %c0_i32 = arith.constant 0 : i32
    %c0_i32_0 = arith.constant 0 : i32
    %c0_i32_1 = arith.constant 0 : i32
    return %c0_i32, %c0_i32_0 : i32, i32
  }
  func.func @transform_5(%arg0: i32) -> (i32, i32) {
    %c0_i32 = arith.constant 0 : i32
    %c0_i32_0 = arith.constant 0 : i32
    return %arg0, %c0_i32 : i32, i32
  }
}

</mosaic_0001>

<bundles_post_ra>
// kernel: anetwork_forward.1
= control target key start
LH: loop header
LB: loop body
LE: loop exit
PB: predicated region body
PF: predicated region fallthrough
CT: control target
= control target key end

     0   :  { %vm29_vm0 = vcmask 64512   ;;  %v291_v0 = vmov 0.0   ;;  %vm292_vm1 = vmmov 0   ;;  %v293_v4 = vmov 0.0|0.0   ;;  %s389_s1 = inlined_call_operand.vmem [shape: f32[8,128], index: 1, kind: input, shape index: {}]   ;;  %s390_s0 = inlined_call_operand.vmem [shape: f32[8,8], index: 0, kind: input, shape index: {}]   ;;  %s391_s3 = inlined_call_operand.vmem [shape: f32[128,8], index: 3, kind: input, shape index: {}]   ;;  %s392_s2 = inlined_call_operand.vmem [shape: f32[1,128], index: 2, kind: input, shape index: {}]   ;;  %s393_s4 = inlined_call_operand.vmem [shape: f32[1,8], index: 4, kind: input, shape index: {}]   ;;  %s394_s5 = inlined_call_operand.vmem [shape: f32[8,8], index: 5, kind: output, shape index: {}]  }
   0x1   :  { %224 = vmatprep.subr.mxu0 %v291_v0  ;;  %v21_v1 = vld [vmem:[%s389_s1] sm:$0xff]  ;;  %226 = vmatprep.mubr.msk.f32.mxu0 %vm292_vm1, %v291_v0  ;;  %v105_v5 = vld [vmem:[%s391_s3 + $0x8] sm:$0xff]  ;;  %v106_v6 = vld [vmem:[%s391_s3 + $0x10] sm:$0xff] }
   0x2   :  { %v20_v2 = vld [vmem:[%s390_s0] sm:$0xff]  ;;  %225 = vmatpush3.msra.mxu0 %v21_v1  ;;  %264 = vmatprep.subr.bf16.mxu1 %v293_v4  ;;  %v107_v7 = vld [vmem:[%s391_s3 + $0x18] sm:$0xff]  ;;  %v109_v11 = vld [vmem:[%s391_s3 + $0x28] sm:$0xff] }
   0x3   :  { %v104_v3 = vld [vmem:[%s391_s3] sm:$0xff]  ;;  %227 = vmatmul.mubr.msk.f32.vlgmr.msra.gmra.mrb[0].mxu0 %vm29_vm0, %v20_v2  ;;  %261 = vmatprep.mubr.msk.f32.mxu1 %vm292_vm1, %v291_v0  ;;  %v268_v9 = vpack.c.bf16 %v107_v7, %v106_v6  ;;  %v110_v13 = vld [vmem:[%s391_s3 + $0x30] sm:$0xff]  ;;  %v111_v14 = vld [vmem:[%s391_s3 + $0x38] sm:$0xff] }
   0x4   :  { %v265_v8 = vpack.c.bf16 %v105_v5, %v104_v3  ;;  %v108_v10 = vld [vmem:[%s391_s3 + $0x20] sm:$0xff]  ;;  %v274_v15 = vpack.c.bf16 %v111_v14, %v110_v13  ;;  %v113_v17 = vld [vmem:[%s391_s3 + $0x48] sm:$0xff]  ;;  %v114_v19 = vld [vmem:[%s391_s3 + $0x50] sm:$0xff] }
   0x5   :  { %v271_v12 = vpack.c.bf16 %v109_v11, %v108_v10  ;;  %v112_v16 = vld [vmem:[%s391_s3 + $0x40] sm:$0xff]  ;;  %v115_v20 = vld [vmem:[%s391_s3 + $0x58] sm:$0xff]  ;;  %v117_v23 = vld [vmem:[%s391_s3 + $0x68] sm:$0xff] }
   0x6   :  { %266 = vmatpush3.bf16.msra.mxu1 %v265_v8  ;;  %v277_v18 = vpack.c.bf16 %v113_v17, %v112_v16  ;;  %v280_v21 = vpack.c.bf16 %v115_v20, %v114_v19  ;;  %v116_v22 = vld [vmem:[%s391_s3 + $0x60] sm:$0xff]  ;;  %v118_v25 = vld [vmem:[%s391_s3 + $0x70] sm:$0xff]  ;;  %v119_v26 = vld [vmem:[%s391_s3 + $0x78] sm:$0xff] }
   0x7   :  { %267 = vmatprep.subr.bf16.mxu1 %v293_v4  ;;  %v283_v24 = vpack.c.bf16 %v117_v23, %v116_v22  ;;  %v286_v27 = vpack.c.bf16 %v119_v26, %v118_v25  ;;  %v202_v28 = vld [vmem:[%s392_s2] ss:$0 sm:$0xff] }
   0x8   :  { %v204_v33 = vld [vmem:[%s393_s4] ss:$0 sm:$0xff] }
   0xa   :  { %269 = vmatpush3.bf16.msra.mxu1 %v268_v9 }
   0xb   :  { %270 = vmatprep.subr.bf16.mxu1 %v293_v4 }
   0xe   :  { %272 = vmatpush3.bf16.msra.mxu1 %v271_v12 }
   0xf   :  { %273 = vmatprep.subr.bf16.mxu1 %v293_v4 }
  0x12   :  { %275 = vmatpush3.bf16.msra.mxu1 %v274_v15 }
  0x13   :  { %276 = vmatprep.subr.bf16.mxu1 %v293_v4 }
  0x16   :  { %278 = vmatpush3.bf16.msra.mxu1 %v277_v18 }
  0x17   :  { %279 = vmatprep.subr.bf16.mxu1 %v293_v4 }
  0x1a   :  { %281 = vmatpush3.bf16.msra.mxu1 %v280_v21 }
  0x1b   :  { %282 = vmatprep.subr.bf16.mxu1 %v293_v4 }
  0x1e   :  { %284 = vmatpush3.bf16.msra.mxu1 %v283_v24 }
  0x1f   :  { %285 = vmatprep.subr.bf16.mxu1 %v293_v4 }
  0x22   :  { %287 = vmatpush3.bf16.msra.mxu1 %v286_v27 }
  0xd6   :  { %v99_v29 = vpop.f32.mrb[0].mxu0 }
  0xd7   :  { %v100_v30 = vadd.f32 %v202_v28, %v99_v29  ;;  %v228_v31 = vpop.f32.mrb[1].mxu0 }
  0xd9   :  { %v103_v32 = vmax.f32 %v100_v30, 0.0 }
  0xdb   :  { %262 = vmatmul.mubr.f32.vlgmr.msra.gmra.mrb[0].mxu1 %v103_v32 }
 0x1ae   :  { %v193_v34 = vpop.f32.mrb[0].mxu1 }
 0x1af   :  { %v194_v35 = vadd.f32 %v204_v33, %v193_v34  ;;  %v263_v36 = vpop.f32.mrb[1].mxu1 }
 0x1b1   :  { %197 = vst.msk [vmem:[%s394_s5] sm:$0xff] %vm29_vm0, %v194_v35 }

</bundles_post_ra>
